<compile_context>
chip_gen: v6e
topology: v6e:2x2x1
jax: 0.10.0
libtpu: 0.0.40
codegen_flags: <defaults>
</compile_context>

<pallas_src>
import numpy as np
import jax
import jax.numpy as jnp
from jax.experimental import pallas as pl
from jax.experimental.pallas import tpu as pltpu

_LANES = 128
_MAX_TILE_ROWS = 2048  # 2048 rows x 128 lanes x 4 B = 1 MiB fp32 per block


def _drop_path_kernel(x_ref, s_ref, o_ref):
    """o = x * per-row scale, lane-broadcast on the VPU."""
    o_ref[...] = x_ref[...] * s_ref[...]


def drop_path_pallas(x, key, drop_prob=0.0, training=False, scale_by_keep=True):
    """DropPath forward matching torch drop_path()."""
    # Identity branch — exactly what the PyTorch module does.
    if drop_prob is None or drop_prob == 0.0 or not training:
        return x

    keep_prob = 1.0 - drop_prob
    N = int(x.shape[0])

    # Per-sample Bernoulli keep mask (framework RNG, like torch's bernoulli_).
    mask = jax.random.bernoulli(key, p=keep_prob, shape=(N,)).astype(x.dtype)
    if keep_prob > 0.0 and scale_by_keep:
        scale = mask / keep_prob
    else:
        scale = mask

    # Lane-dense flatten: (N, ...) -> (N*rows, 128), padding the lane tail.
    S = 1
    for d in x.shape[1:]:
        S *= int(d)
    rows = -(-S // _LANES)            # ceil(S / 128) rows per sample
    padded_s = rows * _LANES
    flat = x.reshape(N, S)
    if padded_s != S:
        flat = jnp.pad(flat, ((0, 0), (0, padded_s - S)))

    total_rows = N * rows
    if total_rows <= _MAX_TILE_ROWS:
        tile = total_rows             # single grid step, block == full array
        padded_rows = total_rows
    else:
        tile = _MAX_TILE_ROWS         # multiple of 8 -> valid sublane tiling
        padded_rows = -(-total_rows // tile) * tile

    flat = flat.reshape(total_rows, _LANES)
    # Per-row scale column (sample i's factor repeated over its `rows` rows).
    scale_rows = jnp.repeat(scale, rows).reshape(total_rows, 1)
    if padded_rows != total_rows:
        flat = jnp.pad(flat, ((0, padded_rows - total_rows), (0, 0)))
        scale_rows = jnp.pad(scale_rows, ((0, padded_rows - total_rows), (0, 0)))

    out = pl.pallas_call(
        _drop_path_kernel,
        out_shape=jax.ShapeDtypeStruct((padded_rows, _LANES), x.dtype),
        grid=(padded_rows // tile,),
        in_specs=[
            pl.BlockSpec((tile, _LANES), lambda r: (r, 0)),   # x rows
            pl.BlockSpec((tile, 1), lambda r: (r, 0)),        # per-row scale
        ],
        out_specs=pl.BlockSpec((tile, _LANES), lambda r: (r, 0)),
        compiler_params=pltpu.CompilerParams(
            dimension_semantics=("parallel",)),
    )(flat, scale_rows)

    out = out[:total_rows].reshape(N, padded_s)[:, :S].reshape(x.shape)
    return out


if __name__ == "__main__":
    N, C, H, W = 2, 4, 16, 16
    drop_prob = 0.3
    scale_by_keep = True

    key = jax.random.PRNGKey(0)
    kx, km = jax.random.split(key)
    x = jax.random.normal(kx, (N, C, H, W), jnp.float32)

    # Training-mode path: the Pallas kernel applies the per-sample scaling.
    out_train = drop_path_pallas(x, km, drop_prob=drop_prob, training=True,
                                 scale_by_keep=scale_by_keep)
    out_train = jax.block_until_ready(out_train)

    # Pure-JAX reference using the identical mask.
    keep_prob = 1.0 - drop_prob
    mask = jax.random.bernoulli(km, p=keep_prob, shape=(N,)).astype(x.dtype)
    scale = mask / keep_prob if (keep_prob > 0.0 and scale_by_keep) else mask
    ref_train = x * scale.reshape((N,) + (1,) * (x.ndim - 1))
    np.testing.assert_allclose(np.asarray(out_train), np.asarray(ref_train),
                               rtol=1e-6, atol=1e-6)

    # Eval-mode / drop_prob==0 path: identity, same as the PyTorch module.
    out_eval = drop_path_pallas(x, km, drop_prob=drop_prob, training=False)
    out_eval = jax.block_until_ready(out_eval)
    np.testing.assert_allclose(np.asarray(out_eval), np.asarray(x))

    print("KERNEL_OK")
</pallas_src>

<mosaic_0001>
module attributes {stable_mosaic.version = 11 : i64} {
  func.func @_drop_path_kernel(%arg0: i32, %arg1: memref<16x128xf32, #tpu.memory_space<vmem>>, %arg2: memref<16x1xf32, #tpu.memory_space<vmem>>, %arg3: memref<16x128xf32, #tpu.memory_space<vmem>>) attributes {dimension_semantics = [#tpu.dimension_semantics<parallel>], iteration_bounds = array<i64: 1>, scalar_prefetch = 0 : i64, scratch_operands = 0 : i64, tpu.core_type = #tpu.core_type<tc>, window_params = [{transform_indices = @transform_0, window_bounds = array<i64: 16, 128>}, {transform_indices = @transform_1, window_bounds = array<i64: 16, 1>}, {transform_indices = @transform_2, window_bounds = array<i64: 16, 128>}]} {
    %c0 = arith.constant 0 : index
    %c0_0 = arith.constant 0 : index
    %0 = vector.load %arg1[%c0, %c0_0] : memref<16x128xf32, #tpu.memory_space<vmem>>, vector<16x128xf32>
    %c0_1 = arith.constant 0 : index
    %c0_2 = arith.constant 0 : index
    %1 = vector.load %arg2[%c0_1, %c0_2] : memref<16x1xf32, #tpu.memory_space<vmem>>, vector<16x1xf32>
    %2 = vector.broadcast %1 : vector<16x1xf32> to vector<16x128xf32>
    %3 = arith.mulf %0, %2 : vector<16x128xf32>
    %c0_3 = arith.constant 0 : index
    %c0_4 = arith.constant 0 : index
    %4 = vector.load %arg3[%c0_3, %c0_4] : memref<16x128xf32, #tpu.memory_space<vmem>>, vector<16x128xf32>
    tpu.vector_store %arg3[%c0_3, %c0_4], %3 {strides = array<i32>} : memref<16x128xf32, #tpu.memory_space<vmem>>, vector<16x128xf32>,
    return
  }
  func.func @transform_0(%arg0: i32) -> (i32, i32) {
    %c0_i32 = arith.constant 0 : i32
    %c0_i32_0 = arith.constant 0 : i32
    return %arg0, %c0_i32 : i32, i32
  }
  func.func @transform_1(%arg0: i32) -> (i32, i32) {
    %c0_i32 = arith.constant 0 : i32
    %c0_i32_0 = arith.constant 0 : i32
    return %arg0, %c0_i32 : i32, i32
  }
  func.func @transform_2(%arg0: i32) -> (i32, i32) {
    %c0_i32 = arith.constant 0 : i32
    %c0_i32_0 = arith.constant 0 : i32
    return %arg0, %c0_i32 : i32, i32
  }
}

</mosaic_0001>

<bundles_post_ra>
// kernel: tpu_custom_call.1
= control target key start
LH: loop header
LB: loop body
LE: loop exit
PB: predicated region body
PF: predicated region fallthrough
CT: control target
= control target key end

     0   :  { %v73_v1 = vmov 0   ;;  %s107_s0 = inlined_call_operand.vmem [shape: f32[16,128], index: 0, kind: input, shape index: {}]   ;;  %s108_s1 = inlined_call_operand.vmem [shape: f32[16,1], index: 1, kind: input, shape index: {}]   ;;  %s109_s2 = inlined_call_operand.hbm [shape: f32[16,128], index: 2, kind: output, shape index: {}]  }
   0x1   :  { %v14_v0 = vld [vmem:[%s108_s1] sm:$0xff]  ;;  %50 = vset.pattern.permute.xlu0 %v73_v1 }
   0x2   :  { %7 = vsyncpa [#allocation3], 0  ;;  %18 = vperm.xlu0 %50, %v14_v0   ;;  %v15_v2 = vld [vmem:[%s108_s1 + $0x8] sm:$0xff]  ;;  %v12_v3 = vld [vmem:[%s107_s0] sm:$0xff]  ;;  %s74_s15 = smov [#allocation2]  }
   0x3   :  { %s35_s16 = sshll.u32 %s74_s15, 4  ;;  %v13_v6 = vld [vmem:[%s107_s0 + $0x8] sm:$0xff]  ;;  %s36_s16 = int_to_ptr.vmem [resolvable:$true] %s35_s16 }
   0x4   :  { %s51_s19 = scalar_lea.vmem %s36_s16, 256  ;;  %p56_p1 = scmp.lt.s32.totalorder %s36_s16, %s36_s16 }
   0x5   :  { %p52_p0 = scmp.ne.s32.totalorder %s36_s16, %s51_s19  ;;  %p57_p2 = scmp.lt.s32.totalorder %s51_s19, %s51_s19 }
   0x6   :  { %23 = vperm.xlu0 %50, %v15_v2  }
   0x7   :  { %p58_p3 = por %p57_p2, %p56_p1 }
   0x9   :  { %p59_p4 = pnand %p58_p3, %p52_p0 }
  0x7d   :  { %v19_v4 = vpop.permute.xlu0 %18 }
  0x7e   :  { %v26_v5 = vmul.f32 %v19_v4, %v12_v3 }
  0x80   :  { %28 = vst [vmem:[#allocation2] sm:$0xff] %v26_v5 }
  0x81   :  { %v24_v7 = vpop.permute.xlu0 %23 }
  0x82   :  { %v27_v8 = vmul.f32 %v24_v7, %v13_v6 }
  0x84   :  { %29 = vst [vmem:[#allocation2 + $0x8] sm:$0xff] %v27_v8 }
  0x85   :  { %62 = shalt.err (!%p59_p4)
}
  0x86   :  { %s75_s1 = smov 128   ;;  %s76_s20 = smov 8  }
  0x87   :  { %41 = dma.vmem_to_hbm [thread:$0]  %s36_s16, 256, %s109_s2, [#allocation3], %s75_s1, %s75_s1, %s76_s20  }
  0x88   :  { %71 = dma.done.wait [#allocation3], 256  }
  0x89   :  { %72 = vsyncadd [#allocation3], 4294967040 }
  0x8a   :  { %45 = vsyncpa [#allocation3], 1 }

</bundles_post_ra>
